<compile_context>
chip_gen: v6e
topology: v6e:2x2x1
jax: 0.10.0
libtpu: 0.0.40
codegen_flags: <defaults>
</compile_context>

<pallas_src>
import functools

import jax
import jax.numpy as jnp
from jax import lax
from jax.experimental import pallas as pl
from jax.experimental.pallas import tpu as pltpu


def _xcorr_kernel(z_ref, x_ref, o_ref, *, h, w, hz, wz, q_pad, out_scale):
    """One grid step: one (VMEM-resident) exemplar applied to B search images."""
    hw = h * w
    zt = z_ref[0]                          # (hz*wz, c): taps x channels (MXU LHS)
    n_b = x_ref.shape[0]                   # B, kept small by the wrapper

    rows = []
    for b in range(n_b):                   # B is small/static; temps die per iteration
        xb = x_ref[b, 0]                   # (c, h*w): channels x flat spatial (MXU RHS)

        # Stage 1 (MXU, single pass in the native dtype): channel contraction
        # for all hz*wz taps at once, f32 accumulation.
        taps = jnp.dot(zt, xb, preferred_element_type=jnp.float32)  # (hz*wz, hw) f32

        # Stage 2: tap (dh, dw) contributes taps[t, p + dh*w + dw] to out[p].
        # Lane-rotate each full-width tap row into place on the XLU, then
        # reduce the hz*wz rows with a stacked full-vreg sum.
        shifted = []
        for dh in range(hz):
            for dw in range(wz):
                t = dh * wz + dw
                s = dh * w + dw
                row = taps[t:t + 1, :]
                if s:
                    row = pltpu.roll(row, hw - s, 1)   # left-rotate by s lanes
                shifted.append(row)
        acc = jnp.sum(jnp.concatenate(shifted, axis=0), axis=0, keepdims=True)  # (1, hw)

        if q_pad <= hw:
            out_row = acc[:, :q_pad]        # tail beyond q is trimmed in the wrapper
        else:
            out_row = jnp.concatenate(
                [acc, jnp.zeros((1, q_pad - hw), acc.dtype)], axis=1)
        rows.append(out_row * out_scale)

    # Single full-sublane store of the whole (B, q_pad) block.
    o_ref[0, 0] = jnp.concatenate(rows, axis=0).astype(o_ref.dtype)


def siamfc_forward(z, x, out_scale=0.001, *, max_x_block_bytes=1536 * 1024):
    """Pallas implementation of SiamFC._fast_xcorr(z, x) * out_scale (f32 output)."""
    nz, c, hz, wz = z.shape
    nx, cx, h, w = x.shape
    assert cx == c and nx % nz == 0 and hz <= h and wz <= w
    ho, wo = h - hz + 1, w - wz + 1
    hw = h * w
    q = (ho - 1) * w + wo                  # flat length covering all output rows
    q_pad = -(-q // 128) * 128             # lane-aligned kernel output width
    nr = nx // nz

    # Exemplars as (nz, hz*wz, c): taps on sublanes, channels on lanes (tiny).
    z_mat = jnp.transpose(z, (0, 2, 3, 1)).reshape(nz, hz * wz, c)
    # Search images as (nr, nz, c, h*w): a *free* reshape of NCHW; sample n = r*nz + g.
    x_mat = x.reshape(nr, nz, c, hw)

    # Samples per grid step: keep the x block around the HBM-roofline sweet
    # spot (~1-2 MiB) and keep the grid at least min(8, nr) steps deep so the
    # pipeline can prefetch and both v7x TensorCores get work.
    per_sample = c * hw * x.dtype.itemsize
    b_cap = max(1, max_x_block_bytes // per_sample)
    min_steps = min(8, nr)
    B = max(d for d in range(1, nr + 1)
            if nr % d == 0 and d <= b_cap and nr // d >= min_steps)
    nsteps = nr // B

    # Generation-aware VMEM budget (v7x: 64 MiB/TC; v5e/v6e: 128 MiB).
    try:
        vmem_cap = pltpu.get_tpu_info().vmem_capacity_bytes
    except Exception:
        vmem_cap = 64 * 2**20
    pad_hw = -(-hw // 128) * 128
    pad_taps = -(-(hz * wz) // 8) * 8
    blk_bytes = 2 * (hz * wz * c * z.dtype.itemsize
                     + B * c * hw * x.dtype.itemsize
                     + B * q_pad * 4)
    tmp_bytes = 2 * pad_taps * pad_hw * 4 + (1 << 20)
    vmem_limit = int(min(3 * vmem_cap // 4, max(blk_bytes + tmp_bytes, 16 << 20)))

    kernel = functools.partial(_xcorr_kernel, h=h, w=w, hz=hz, wz=wz,
                               q_pad=q_pad, out_scale=out_scale)

    out_flat = pl.pallas_call(
        kernel,
        out_shape=jax.ShapeDtypeStruct((nz, nsteps, B, q_pad), jnp.float32),
        grid=(nz, nsteps),
        in_specs=[
            # exemplar block index depends only on the outer axis -> stays resident
            pl.BlockSpec((1, hz * wz, c), lambda g, r: (g, 0, 0)),
            # (option for v5e if DMA is still exposed: pipeline_mode=pl.Buffered(3))
            pl.BlockSpec((B, 1, c, hw), lambda g, r: (r, g, 0, 0)),
        ],
        out_specs=pl.BlockSpec((1, 1, B, q_pad), lambda g, r: (g, r, 0, 0)),
        compiler_params=pltpu.CompilerParams(
            dimension_semantics=("parallel", "parallel"),
            vmem_limit_bytes=vmem_limit,
        ),
    )(z_mat, x_mat)

    # (nz, nsteps, B, q_pad) -> (nx, q) with sample n = r*nz + g, then re-window
    # the flat vector: out[n, 0, i, j] lives at flat position i*w + j.
    out_flat = out_flat.reshape(nz, nr, q_pad)[..., :q]
    out_flat = out_flat.transpose(1, 0, 2).reshape(nx, q)
    out_flat = jnp.pad(out_flat, ((0, 0), (0, ho * w - q)))   # pad == wz - 1
    return out_flat.reshape(nx, 1, ho, w)[..., :wo]


def _reference(z, x, out_scale=0.001):
    """Pure-JAX replica of the PyTorch forward for validation."""
    nz, c, hz, wz = z.shape
    nx, _, h, w = x.shape
    xr = x.reshape(nx // nz, nz * c, h, w)
    out = lax.conv_general_dilated(
        xr, z, window_strides=(1, 1), padding="VALID",
        dimension_numbers=("NCHW", "OIHW", "NCHW"),
        feature_group_count=nz,
        precision=lax.Precision.HIGHEST)
    return out.reshape(nx, -1, out.shape[-2], out.shape[-1]) * out_scale


if __name__ == "__main__":
    key = jax.random.PRNGKey(0)
    kz, kx = jax.random.split(key)

    nz, nx, c = 2, 4, 4
    hz, wz = 6, 6
    h, w = 16, 16

    # bf16 "from the producer": the kernel consumes it directly (no wrapper cast).
    z = jax.random.normal(kz, (nz, c, hz, wz), dtype=jnp.float32).astype(jnp.bfloat16)
    x = jax.random.normal(kx, (nx, c, h, w), dtype=jnp.float32).astype(jnp.bfloat16)

    out = jax.block_until_ready(siamfc_forward(z, x, out_scale=0.001))
    # Reference in f32 on the same bf16-valued inputs; the kernel computes exact
    # bf16 products with f32 accumulation, so tight tolerances still hold.
    ref = _reference(z.astype(jnp.float32), x.astype(jnp.float32), out_scale=0.001)

    assert out.shape == (nx, 1, h - hz + 1, w - wz + 1), out.shape
    max_err = float(jnp.max(jnp.abs(out - ref)))
    assert jnp.allclose(out, ref, atol=1e-4, rtol=1e-4), f"mismatch vs reference: {max_err}"

    print("KERNEL_OK")
</pallas_src>

<mosaic_0001>
module attributes {stable_mosaic.version = 11 : i64} {
  func.func @_xcorr_kernel(%arg0: i32, %arg1: i32, %arg2: memref<1x36x4xbf16, #tpu.memory_space<vmem>>, %arg3: memref<1x1x4x256xbf16, #tpu.memory_space<vmem>>, %arg4: memref<1x1x1x256xf32, #tpu.memory_space<vmem>>) attributes {dimension_semantics = [#tpu.dimension_semantics<parallel>, #tpu.dimension_semantics<parallel>], iteration_bounds = array<i64: 2, 2>, scalar_prefetch = 0 : i64, scratch_operands = 0 : i64, tpu.core_type = #tpu.core_type<tc>, window_params = [{transform_indices = @transform_0, window_bounds = array<i64: 1, 36, 4>}, {transform_indices = @transform_1, window_bounds = array<i64: 1, 1, 4, 256>}, {transform_indices = @transform_2, window_bounds = array<i64: 1, 1, 1, 256>}]} {
    %c0 = arith.constant 0 : index
    %c0_0 = arith.constant 0 : index
    %c0_1 = arith.constant 0 : index
    %0 = vector.load %arg2[%c0, %c0_0, %c0_1] : memref<1x36x4xbf16, #tpu.memory_space<vmem>>, vector<1x36x4xbf16>
    %1 = vector.shape_cast %0 : vector<1x36x4xbf16> to vector<36x4xbf16>
    %c0_2 = arith.constant 0 : index
    %c0_3 = arith.constant 0 : index
    %c0_4 = arith.constant 0 : index
    %c0_5 = arith.constant 0 : index
    %2 = vector.load %arg3[%c0_2, %c0_3, %c0_4, %c0_5] : memref<1x1x4x256xbf16, #tpu.memory_space<vmem>>, vector<1x1x4x256xbf16>
    %3 = vector.shape_cast %2 : vector<1x1x4x256xbf16> to vector<4x256xbf16>
    %cst = arith.constant dense<0.000000e+00> : vector<36x256xf32>
    %4 = tpu.matmul %1, %3, %cst {dimension_numbers = #tpu.dot_dimension_numbers<[1], [0], [0], [1], [0, 0, 1, 1], [], []>} : vector<36x4xbf16>, vector<4x256xbf16>, vector<36x256xf32> -> vector<36x256xf32>
    %5 = vector.extract_strided_slice %4 {offsets = [0, 0], sizes = [1, 256], strides = [1, 1]} : vector<36x256xf32> to vector<1x256xf32>
    %6 = vector.extract_strided_slice %4 {offsets = [1, 0], sizes = [1, 256], strides = [1, 1]} : vector<36x256xf32> to vector<1x256xf32>
    %c255_i32 = arith.constant 255 : i32
    %7 = tpu.dynamic_rotate %6 by %c255_i32 dim 1 : vector<1x256xf32>, i32 -> vector<1x256xf32>
    %8 = vector.extract_strided_slice %4 {offsets = [2, 0], sizes = [1, 256], strides = [1, 1]} : vector<36x256xf32> to vector<1x256xf32>
    %c254_i32 = arith.constant 254 : i32
    %9 = tpu.dynamic_rotate %8 by %c254_i32 dim 1 : vector<1x256xf32>, i32 -> vector<1x256xf32>
    %10 = vector.extract_strided_slice %4 {offsets = [3, 0], sizes = [1, 256], strides = [1, 1]} : vector<36x256xf32> to vector<1x256xf32>
    %c253_i32 = arith.constant 253 : i32
    %11 = tpu.dynamic_rotate %10 by %c253_i32 dim 1 : vector<1x256xf32>, i32 -> vector<1x256xf32>
    %12 = vector.extract_strided_slice %4 {offsets = [4, 0], sizes = [1, 256], strides = [1, 1]} : vector<36x256xf32> to vector<1x256xf32>
    %c252_i32 = arith.constant 252 : i32
    %13 = tpu.dynamic_rotate %12 by %c252_i32 dim 1 : vector<1x256xf32>, i32 -> vector<1x256xf32>
    %14 = vector.extract_strided_slice %4 {offsets = [5, 0], sizes = [1, 256], strides = [1, 1]} : vector<36x256xf32> to vector<1x256xf32>
    %c251_i32 = arith.constant 251 : i32
    %15 = tpu.dynamic_rotate %14 by %c251_i32 dim 1 : vector<1x256xf32>, i32 -> vector<1x256xf32>
    %16 = vector.extract_strided_slice %4 {offsets = [6, 0], sizes = [1, 256], strides = [1, 1]} : vector<36x256xf32> to vector<1x256xf32>
    %c240_i32 = arith.constant 240 : i32
    %17 = tpu.dynamic_rotate %16 by %c240_i32 dim 1 : vector<1x256xf32>, i32 -> vector<1x256xf32>
    %18 = vector.extract_strided_slice %4 {offsets = [7, 0], sizes = [1, 256], strides = [1, 1]} : vector<36x256xf32> to vector<1x256xf32>
    %c239_i32 = arith.constant 239 : i32
    %19 = tpu.dynamic_rotate %18 by %c239_i32 dim 1 : vector<1x256xf32>, i32 -> vector<1x256xf32>
    %20 = vector.extract_strided_slice %4 {offsets = [8, 0], sizes = [1, 256], strides = [1, 1]} : vector<36x256xf32> to vector<1x256xf32>
    %c238_i32 = arith.constant 238 : i32
    %21 = tpu.dynamic_rotate %20 by %c238_i32 dim 1 : vector<1x256xf32>, i32 -> vector<1x256xf32>
    %22 = vector.extract_strided_slice %4 {offsets = [9, 0], sizes = [1, 256], strides = [1, 1]} : vector<36x256xf32> to vector<1x256xf32>
    %c237_i32 = arith.constant 237 : i32
    %23 = tpu.dynamic_rotate %22 by %c237_i32 dim 1 : vector<1x256xf32>, i32 -> vector<1x256xf32>
    %24 = vector.extract_strided_slice %4 {offsets = [10, 0], sizes = [1, 256], strides = [1, 1]} : vector<36x256xf32> to vector<1x256xf32>
    %c236_i32 = arith.constant 236 : i32
    %25 = tpu.dynamic_rotate %24 by %c236_i32 dim 1 : vector<1x256xf32>, i32 -> vector<1x256xf32>
    %26 = vector.extract_strided_slice %4 {offsets = [11, 0], sizes = [1, 256], strides = [1, 1]} : vector<36x256xf32> to vector<1x256xf32>
    %c235_i32 = arith.constant 235 : i32
    %27 = tpu.dynamic_rotate %26 by %c235_i32 dim 1 : vector<1x256xf32>, i32 -> vector<1x256xf32>
    %28 = vector.extract_strided_slice %4 {offsets = [12, 0], sizes = [1, 256], strides = [1, 1]} : vector<36x256xf32> to vector<1x256xf32>
    %c224_i32 = arith.constant 224 : i32
    %29 = tpu.dynamic_rotate %28 by %c224_i32 dim 1 : vector<1x256xf32>, i32 -> vector<1x256xf32>
    %30 = vector.extract_strided_slice %4 {offsets = [13, 0], sizes = [1, 256], strides = [1, 1]} : vector<36x256xf32> to vector<1x256xf32>
    %c223_i32 = arith.constant 223 : i32
    %31 = tpu.dynamic_rotate %30 by %c223_i32 dim 1 : vector<1x256xf32>, i32 -> vector<1x256xf32>
    %32 = vector.extract_strided_slice %4 {offsets = [14, 0], sizes = [1, 256], strides = [1, 1]} : vector<36x256xf32> to vector<1x256xf32>
    %c222_i32 = arith.constant 222 : i32
    %33 = tpu.dynamic_rotate %32 by %c222_i32 dim 1 : vector<1x256xf32>, i32 -> vector<1x256xf32>
    %34 = vector.extract_strided_slice %4 {offsets = [15, 0], sizes = [1, 256], strides = [1, 1]} : vector<36x256xf32> to vector<1x256xf32>
    %c221_i32 = arith.constant 221 : i32
    %35 = tpu.dynamic_rotate %34 by %c221_i32 dim 1 : vector<1x256xf32>, i32 -> vector<1x256xf32>
    %36 = vector.extract_strided_slice %4 {offsets = [16, 0], sizes = [1, 256], strides = [1, 1]} : vector<36x256xf32> to vector<1x256xf32>
    %c220_i32 = arith.constant 220 : i32
    %37 = tpu.dynamic_rotate %36 by %c220_i32 dim 1 : vector<1x256xf32>, i32 -> vector<1x256xf32>
    %38 = vector.extract_strided_slice %4 {offsets = [17, 0], sizes = [1, 256], strides = [1, 1]} : vector<36x256xf32> to vector<1x256xf32>
    %c219_i32 = arith.constant 219 : i32
    %39 = tpu.dynamic_rotate %38 by %c219_i32 dim 1 : vector<1x256xf32>, i32 -> vector<1x256xf32>
    %40 = vector.extract_strided_slice %4 {offsets = [18, 0], sizes = [1, 256], strides = [1, 1]} : vector<36x256xf32> to vector<1x256xf32>
    %c208_i32 = arith.constant 208 : i32
    %41 = tpu.dynamic_rotate %40 by %c208_i32 dim 1 : vector<1x256xf32>, i32 -> vector<1x256xf32>
    %42 = vector.extract_strided_slice %4 {offsets = [19, 0], sizes = [1, 256], strides = [1, 1]} : vector<36x256xf32> to vector<1x256xf32>
    %c207_i32 = arith.constant 207 : i32
    %43 = tpu.dynamic_rotate %42 by %c207_i32 dim 1 : vector<1x256xf32>, i32 -> vector<1x256xf32>
    %44 = vector.extract_strided_slice %4 {offsets = [20, 0], sizes = [1, 256], strides = [1, 1]} : vector<36x256xf32> to vector<1x256xf32>
    %c206_i32 = arith.constant 206 : i32
    %45 = tpu.dynamic_rotate %44 by %c206_i32 dim 1 : vector<1x256xf32>, i32 -> vector<1x256xf32>
    %46 = vector.extract_strided_slice %4 {offsets = [21, 0], sizes = [1, 256], strides = [1, 1]} : vector<36x256xf32> to vector<1x256xf32>
    %c205_i32 = arith.constant 205 : i32
    %47 = tpu.dynamic_rotate %46 by %c205_i32 dim 1 : vector<1x256xf32>, i32 -> vector<1x256xf32>
    %48 = vector.extract_strided_slice %4 {offsets = [22, 0], sizes = [1, 256], strides = [1, 1]} : vector<36x256xf32> to vector<1x256xf32>
    %c204_i32 = arith.constant 204 : i32
    %49 = tpu.dynamic_rotate %48 by %c204_i32 dim 1 : vector<1x256xf32>, i32 -> vector<1x256xf32>
    %50 = vector.extract_strided_slice %4 {offsets = [23, 0], sizes = [1, 256], strides = [1, 1]} : vector<36x256xf32> to vector<1x256xf32>
    %c203_i32 = arith.constant 203 : i32
    %51 = tpu.dynamic_rotate %50 by %c203_i32 dim 1 : vector<1x256xf32>, i32 -> vector<1x256xf32>
    %52 = vector.extract_strided_slice %4 {offsets = [24, 0], sizes = [1, 256], strides = [1, 1]} : vector<36x256xf32> to vector<1x256xf32>
    %c192_i32 = arith.constant 192 : i32
    %53 = tpu.dynamic_rotate %52 by %c192_i32 dim 1 : vector<1x256xf32>, i32 -> vector<1x256xf32>
    %54 = vector.extract_strided_slice %4 {offsets = [25, 0], sizes = [1, 256], strides = [1, 1]} : vector<36x256xf32> to vector<1x256xf32>
    %c191_i32 = arith.constant 191 : i32
    %55 = tpu.dynamic_rotate %54 by %c191_i32 dim 1 : vector<1x256xf32>, i32 -> vector<1x256xf32>
    %56 = vector.extract_strided_slice %4 {offsets = [26, 0], sizes = [1, 256], strides = [1, 1]} : vector<36x256xf32> to vector<1x256xf32>
    %c190_i32 = arith.constant 190 : i32
    %57 = tpu.dynamic_rotate %56 by %c190_i32 dim 1 : vector<1x256xf32>, i32 -> vector<1x256xf32>
    %58 = vector.extract_strided_slice %4 {offsets = [27, 0], sizes = [1, 256], strides = [1, 1]} : vector<36x256xf32> to vector<1x256xf32>
    %c189_i32 = arith.constant 189 : i32
    %59 = tpu.dynamic_rotate %58 by %c189_i32 dim 1 : vector<1x256xf32>, i32 -> vector<1x256xf32>
    %60 = vector.extract_strided_slice %4 {offsets = [28, 0], sizes = [1, 256], strides = [1, 1]} : vector<36x256xf32> to vector<1x256xf32>
    %c188_i32 = arith.constant 188 : i32
    %61 = tpu.dynamic_rotate %60 by %c188_i32 dim 1 : vector<1x256xf32>, i32 -> vector<1x256xf32>
    %62 = vector.extract_strided_slice %4 {offsets = [29, 0], sizes = [1, 256], strides = [1, 1]} : vector<36x256xf32> to vector<1x256xf32>
    %c187_i32 = arith.constant 187 : i32
    %63 = tpu.dynamic_rotate %62 by %c187_i32 dim 1 : vector<1x256xf32>, i32 -> vector<1x256xf32>
    %64 = vector.extract_strided_slice %4 {offsets = [30, 0], sizes = [1, 256], strides = [1, 1]} : vector<36x256xf32> to vector<1x256xf32>
    %c176_i32 = arith.constant 176 : i32
    %65 = tpu.dynamic_rotate %64 by %c176_i32 dim 1 : vector<1x256xf32>, i32 -> vector<1x256xf32>
    %66 = vector.extract_strided_slice %4 {offsets = [31, 0], sizes = [1, 256], strides = [1, 1]} : vector<36x256xf32> to vector<1x256xf32>
    %c175_i32 = arith.constant 175 : i32
    %67 = tpu.dynamic_rotate %66 by %c175_i32 dim 1 : vector<1x256xf32>, i32 -> vector<1x256xf32>
    %68 = vector.extract_strided_slice %4 {offsets = [32, 0], sizes = [1, 256], strides = [1, 1]} : vector<36x256xf32> to vector<1x256xf32>
    %c174_i32 = arith.constant 174 : i32
    %69 = tpu.dynamic_rotate %68 by %c174_i32 dim 1 : vector<1x256xf32>, i32 -> vector<1x256xf32>
    %70 = vector.extract_strided_slice %4 {offsets = [33, 0], sizes = [1, 256], strides = [1, 1]} : vector<36x256xf32> to vector<1x256xf32>
    %c173_i32 = arith.constant 173 : i32
    %71 = tpu.dynamic_rotate %70 by %c173_i32 dim 1 : vector<1x256xf32>, i32 -> vector<1x256xf32>
    %72 = vector.extract_strided_slice %4 {offsets = [34, 0], sizes = [1, 256], strides = [1, 1]} : vector<36x256xf32> to vector<1x256xf32>
    %c172_i32 = arith.constant 172 : i32
    %73 = tpu.dynamic_rotate %72 by %c172_i32 dim 1 : vector<1x256xf32>, i32 -> vector<1x256xf32>
    %74 = vector.extract_strided_slice %4 {offsets = [35, 0], sizes = [1, 256], strides = [1, 1]} : vector<36x256xf32> to vector<1x256xf32>
    %c171_i32 = arith.constant 171 : i32
    %75 = tpu.dynamic_rotate %74 by %c171_i32 dim 1 : vector<1x256xf32>, i32 -> vector<1x256xf32>
    %76 = tpu.concatenate %5, %7, %9, %11, %13, %15, %17, %19, %21, %23, %25, %27, %29, %31, %33, %35 in 0 : vector<1x256xf32>, vector<1x256xf32>, vector<1x256xf32>, vector<1x256xf32>, vector<1x256xf32>, vector<1x256xf32>, vector<1x256xf32>, vector<1x256xf32>, vector<1x256xf32>, vector<1x256xf32>, vector<1x256xf32>, vector<1x256xf32>, vector<1x256xf32>, vector<1x256xf32>, vector<1x256xf32>, vector<1x256xf32> -> vector<16x256xf32>
    %77 = tpu.concatenate %37, %39, %41, %43, %45, %47, %49, %51, %53, %55, %57, %59, %61, %63, %65, %67 in 0 : vector<1x256xf32>, vector<1x256xf32>, vector<1x256xf32>, vector<1x256xf32>, vector<1x256xf32>, vector<1x256xf32>, vector<1x256xf32>, vector<1x256xf32>, vector<1x256xf32>, vector<1x256xf32>, vector<1x256xf32>, vector<1x256xf32>, vector<1x256xf32>, vector<1x256xf32>, vector<1x256xf32>, vector<1x256xf32> -> vector<16x256xf32>
    %78 = tpu.concatenate %69, %71, %73, %75 in 0 : vector<1x256xf32>, vector<1x256xf32>, vector<1x256xf32>, vector<1x256xf32> -> vector<4x256xf32>
    %79 = tpu.concatenate %76, %77, %78 in 0 : vector<16x256xf32>, vector<16x256xf32>, vector<4x256xf32> -> vector<36x256xf32>
    %cst_6 = arith.constant dense<0.000000e+00> : vector<256xf32>
    %80 = vector.multi_reduction <add>, %79, %cst_6 [0] : vector<36x256xf32> to vector<256xf32>
    %81 = vector.shape_cast %80 : vector<256xf32> to vector<1x256xf32>
    %cst_7 = arith.constant 1.000000e-03 : f32
    %82 = vector.broadcast %cst_7 : f32 to vector<1x256xf32>
    %83 = arith.mulf %81, %82 : vector<1x256xf32>
    %c0_8 = arith.constant 0 : index
    %c0_9 = arith.constant 0 : index
    %c0_10 = arith.constant 0 : index
    %c0_11 = arith.constant 0 : index
    %84 = vector.load %arg4[%c0_8, %c0_9, %c0_10, %c0_11] : memref<1x1x1x256xf32, #tpu.memory_space<vmem>>, vector<1x1x1x256xf32>
    %85 = vector.shape_cast %84 : vector<1x1x1x256xf32> to vector<1x256xf32>
    %86 = vector.shape_cast %83 : vector<1x256xf32> to vector<1x1x1x256xf32>
    tpu.vector_store %arg4[%c0_8, %c0_9, %c0_10, %c0_11], %86 {strides = array<i32>} : memref<1x1x1x256xf32, #tpu.memory_space<vmem>>, vector<1x1x1x256xf32>,
    return
  }
  func.func @transform_0(%arg0: i32, %arg1: i32) -> (i32, i32, i32) {
    %c0_i32 = arith.constant 0 : i32
    %c0_i32_0 = arith.constant 0 : i32
    %c0_i32_1 = arith.constant 0 : i32
    return %arg0, %c0_i32, %c0_i32_0 : i32, i32, i32
  }
  func.func @transform_1(%arg0: i32, %arg1: i32) -> (i32, i32, i32, i32) {
    %c0_i32 = arith.constant 0 : i32
    %c0_i32_0 = arith.constant 0 : i32
    %c0_i32_1 = arith.constant 0 : i32
    return %arg1, %arg0, %c0_i32, %c0_i32_0 : i32, i32, i32, i32
  }
  func.func @transform_2(%arg0: i32, %arg1: i32) -> (i32, i32, i32, i32) {
    %c0_i32 = arith.constant 0 : i32
    %c0_i32_0 = arith.constant 0 : i32
    %c0_i32_1 = arith.constant 0 : i32
    return %arg0, %arg1, %c0_i32, %c0_i32_0 : i32, i32, i32, i32
  }
}

</mosaic_0001>

<bundles_post_ra>
// kernel: tpu_custom_call.1
= control target key start
LH: loop header
LB: loop body
LE: loop exit
PB: predicated region body
PF: predicated region fallthrough
CT: control target
= control target key end

     0   :  { %7 = vsyncpa [#allocation3], 0  ;;  %s1833_s0 = inlined_call_operand.vmem [shape: bf16[2,36,4], index: 0, kind: input, shape index: {}]   ;;  %s1834_s1 = inlined_call_operand.vmem [shape: bf16[2,2,4,256], index: 1, kind: input, shape index: {}]   ;;  %s1835_s2 = inlined_call_operand.hbm [shape: f32[2,2,1,256], index: 2, kind: output, shape index: {}]  }
   0x1   :  { %9 = vsyncpa [#allocation3 + $0x1], 0  ;;  %s1375_s9 = smov 0   ;;  %s1377_s10 = smov 0  }
   0x2   :  { %s1379_s11 = smov 0   ;;  %s1381_s12 = smov 0  }
   0x3   :  { %s1383_s13 = smov 0   ;;  %s1385_s14 = smov 0  }
   0x4   :  { %s1387_s15 = smov 0   ;;  %s1389_s16 = smov 0  }
   0x5 LB: > { %s1090_s17 = sadd.s32 4294967295, %s1320_s16   ;;  %s1091_s18 = sadd.s32 4294967294, %s1320_s16   ;;  %s1320_s16 = sphi %s1389_s16, %s15_s16   ;;  %s1316_s15 = sphi %s1387_s15, %s1844_s15   ;;  %s1312_s14 = sphi %s1385_s14, %s1843_s14   ;;  %s1308_s13 = sphi %s1383_s13, %s1842_s13   ;;  %s1304_s12 = sphi %s1381_s12, %s1841_s12   ;;  %s1300_s11 = sphi %s1379_s11, %s1840_s11   ;;  %s1296_s10 = sphi %s1377_s10, %s1839_s10   ;;  %s1292_s9 = sphi %s1375_s9, %s1838_s9  }
   0x6   : > { %s24_s19 = sadd.s32 1, %s1312_s14  ;;  %s27_s20 = sadd.s32 1, %s1316_s15 }
   0x7   : > { %p25_p0 = scmp.ge.s32.totalorder %s24_s19, 2  ;;  %p100_p1 = scmp.ne.s32.totalorder %s1300_s11, %s1296_s10 }
   0x8   : > { %p101_p2 = scmp.eq.s32.totalorder %s1090_s17, 3  ;;  %p106_p5 = scmp.ne.s32.totalorder %s1296_s10, %s1292_s9 }
   0x9   : > { %s1846_s19 = smov (%p25_p0, %s24_s19), 0  ;;  %s1848_s20 = smov (!%p25_p0, %s27_s20), %s1316_s15 }
   0xa   : > { %s86_s21 = ssub.s32 %s1312_s14, %s1846_s19  ;;  %p1426_p3 = por %p101_p2, %p100_p1 }
   0xb   : > { %p29_p4 = scmp.ge.s32.totalorder %s1848_s20, 2  ;;  %p107_p6 = scmp.eq.s32.totalorder %s1091_s18, 3 }
   0xc   : > { %p1094_p7 = scmp.ge.s32.totalorder %s1320_s16, 1  ;;  %p145_p9 = scmp.lt.s32.totalorder %s1320_s16, 5 }
   0xd   : > { %s1850_s20 = smov (%p29_p4, %s1848_s20), 0  ;;  %p1435_p8 = por %p107_p6, %p106_p5 }
   0xe   : > { %s85_s24 = ssub.s32 %s1316_s15, %s1850_s20  ;;  %s90_s25 = sadd.s32 1, %s1300_s11 }
   0xf   : > { %s87_s26 = sor.u32 %s86_s21, %s85_s24  ;;  %p146_p10 = pnand %p1094_p7, %p145_p9 }
  0x10   : > { %p88_p11 = scmp.eq.s32.totalorder %s87_s26, 0  ;;  %p176_p12 = scmp.lt.s32.totalorder (!%p146_p10), %s1308_s13, 1 }
  0x11   : > { %149 = sbr.rel (%p146_p10) target bundleno = 522 (0x20a), region = 28  ;;  %p181_p13 = scmp.lt.s32.totalorder (!%p146_p10), %s1304_s12, 1 }
  0x12   : > { %s1444_s27 = scalar_select %p88_p11, %s1300_s11, %s90_s25  }
  0x13   : > { %s1323_s25 = smov (!%p146_p10), 92   ;;  %s1324_s26 = smov (!%p146_p10), 126  }
  0x14   : > { %s1330_s5 = smov (!%p146_p10), 112   ;;  %s1331_s6 = smov (!%p146_p10), 111  }
  0x15   : > { %s1335_s18 = smov (!%p146_p10), 77   ;;  %s1336_s21 = smov (!%p146_p10), 76  }
  0x16   : > { %v1322_v0 = vmov 0   ;;  %s177_s28 = scalar_select %p176_p12, %s1308_s13, 1  ;;  %vm229_vm0 = vcmask 1041408   ;;  %vm219_vm1 = vcmask 31744   ;;  %vm762_vm14 = vcmask 1040384  }
  0x17   : > { %268 = vmatprep.mubr.bf16.mxu0 %v1322_v0  ;;  %278 = vmatprep.mubr.bf16.mxu1 %v1322_v0  ;;  %s182_s29 = scalar_select %p181_p13, %s1304_s12, 1  ;;  %vm767_vm15 = vcmask 1042432  }
  0x18   : > { %s1116_s30 = smul.u32 20, %s177_s28  ;;  %s1097_s3 = sshll.u32 %s177_s28, 1 }
  0x19   : > { %s1098_s4 = sshll.u32 %s182_s29, 2  ;;  %s1325_s28 = smov 127  }
  0x1a   : > { %s180_s7 = scalar_lea.vmem %s1833_s0, %s1116_s30  ;;  %s187_s8 = sadd.s32 %s1098_s4, %s1097_s3 }
  0x1b   : > { %s1099_s17 = sshll.u32 %s187_s8, 1  ;;  %v1225_v4 = vld [vmem:[%s180_s7] sm:$0xff]   ;;  %v1226_v5 = vld [vmem:[%s180_s7 + $0x8] sm:$0xff]   ;;  %v1227_v6 = vld [vmem:[%s180_s7 + $0x10] ss:$0 sps:$4 sm:$0x33]  }
  0x1c   : > { %s189_s24 = scalar_lea.vmem %s1834_s1, %s1099_s17  ;;  %s1326_s29 = smov 91  }
  0x1d   : > { %v1103_v1 = vld.sshfl [vmem:[%s189_s24] sm:$0x33 pattern:$0x76325410]  ;;  %s1327_s30 = smov 125   ;;  %s1328_s3 = smov 124  }
  0x1e   : > { %v218_v2 = vcombine.high %v1103_v1, %v1103_v1  ;;  %v231_v3 = vsel %vm229_vm0, %v1103_v1, 0  ;;  %s1329_s4 = smov 123   ;;  %s1332_s7 = smov 80  }
  0x1f   : > { %s1333_s8 = smov 79   ;;  %s1334_s17 = smov 78  }
  0x20   : > { %1104 = vmatprep.subr.msk.bf16.mxu0 %vm229_vm0, %v218_v2  ;;  %1114 = vmatprep.subr.msk.bf16.mxu1 %vm229_vm0, %v218_v2  ;;  %s1337_s24 = smov 75  }
  0x21   : > { %251 = vmatpush1.bf16.msra.mxu0 %v231_v3  ;;  %1115 = vmatpush1.bf16.msra.mxu1 %v231_v3 }
  0x24   : > { %1105 = vmatmul.mubr.msk.bf16.vlgmr.msra.gmra.mxu0 %vm219_vm1, %v1225_v4  ;;  %1106 = vmatmul.mubr.msk.bf16.vlgmr.msra.gmra.mxu1 %vm219_vm1, %v1226_v5 }
  0x25   : > { %288 = vmatprep.mubr.bf16.mxu1 %v1322_v0 }
  0x2c   : > { %1107 = vmatmul.mubr.msk.bf16.gmra.mxu1 %vm219_vm1, %v1227_v6  ;;  %vm770_vm1 = vcmask 1043456  }
  0xe4   : > { %v1459_v7 = vpop.f32.mrf.mxu0  ;;  %v1461_v8 = vpop.f32.mrf.mxu1 }
  0xe5   : > { %464 = vrot.lane.b32.xlu0 %v1461_v8, %s1323_s25  ;;  %v312_v9 = vrot.slane %v1459_v7, 2  ;;  %v299_v11 = vrot.slane %v1459_v7, 1  ;;  %v473_v13 = vrot.slane %v1461_v8, 1  ;;  %v323_v15 = vrot.slane %v1459_v7, 3 }
  0xe6   : > { %v1465_v10 = vpop.f32.mrf.mxu1  ;;  %v1478_v17 = vpop.f32.mrf.mxu0  ;;  %v334_v19 = vrot.slane %v1459_v7, 4  ;;  %v345_v23 = vrot.slane %v1459_v7, 5  ;;  %v356_v25 = vrot.slane %v1459_v7, 6  ;;  %v367_v27 = vrot.slane %v1459_v7, 7 }
  0xe7   : > { %316 = vrot.lane.b32.xlu1 %v312_v9, %s1324_s26  ;;  %v313_v21 = vrot.slane %v1478_v17, 2  ;;  %v324_v24 = vrot.slane %v1478_v17, 3  ;;  %v335_v26 = vrot.slane %v1478_v17, 4  ;;  %v346_v28 = vrot.slane %v1478_v17, 5 }
  0xe8   : > { %v1468_v12 = vpop.f32.mrf.mxu1  ;;  %v484_v29 = vrot.slane %v1461_v8, 2  ;;  %v357_v30 = vrot.slane %v1478_v17, 6  ;;  %v495_v31 = vrot.slane %v1461_v8, 3  ;;  %v368_v32 = vrot.slane %v1478_v17, 7  ;;  %v274_v43 = vpop.f32.mrf.mxu0 }
  0xe9   : > { %303 = vrot.lane.b32.xlu0 %v299_v11, %s1325_s28  ;;  %v506_v33 = vrot.slane %v1461_v8, 4  ;;  %v485_v34 = vrot.slane %v1465_v10, 2  ;;  %v517_v35 = vrot.slane %v1461_v8, 5  ;;  %v496_v36 = vrot.slane %v1465_v10, 3 }
  0xea   : > { %v1472_v14 = vpop.f32.mrf.mxu1  ;;  %v528_v37 = vrot.slane %v1461_v8, 6  ;;  %v507_v38 = vrot.slane %v1465_v10, 4  ;;  %v539_v39 = vrot.slane %v1461_v8, 7  ;;  %v518_v40 = vrot.slane %v1465_v10, 5  ;;  %v276_v46 = vpop.f32.mrf.mxu0 }
  0xeb   : > { %477 = vrot.lane.b32.xlu1 %v473_v13, %s1326_s29  ;;  %v300_v41 = vrot.slane %v1478_v17, 1  ;;  %v529_v42 = vrot.slane %v1465_v10, 6  ;;  %v540_v44 = vrot.slane %v1465_v10, 7  ;;  %v474_v45 = vrot.slane %v1465_v10, 1 }
  0xec   : > { %v1476_v16 = vpop.f32.mrf.mxu1  ;;  %v387_v47 = vrot.slane %v274_v43, 1  ;;  %v388_v48 = vrot.slane %v276_v46, 1  ;;  %v398_v49 = vrot.slane %v274_v43, 2  ;;  %v399_v50 = vrot.slane %v276_v46, 2 }
  0xed   : > { %327 = vrot.lane.b32.xlu0 %v323_v15, %s1327_s30  ;;  %v409_v51 = vrot.slane %v274_v43, 3  ;;  %v410_v52 = vrot.slane %v276_v46, 3  ;;  %v420_v53 = vrot.slane %v274_v43, 4  ;;  %v421_v54 = vrot.slane %v276_v46, 4 }
  0xee   : > { %v1480_v18 = vpop.f32.mrf.mxu1  ;;  %v431_v55 = vrot.slane %v274_v43, 5  ;;  %v432_v56 = vrot.slane %v276_v46, 5  ;;  %v559_v57 = vrot.slane %v1468_v12, 1  ;;  %v560_v58 = vrot.slane %v1472_v14, 1 }
  0xef   : > { %466 = vrot.lane.b32.xlu1 %v1465_v10, %s1323_s25  ;;  %s1338_s25 = smov 110   ;;  %v442_v59 = vrot.slane %v274_v43, 6  ;;  %v443_v60 = vrot.slane %v276_v46, 6  ;;  %v570_v61 = vrot.slane %v1468_v12, 2  ;;  %v571_v62 = vrot.slane %v1472_v14, 2 }
  0xf0   : > { %v294_v20 = vpop.f32.mrf.mxu1  ;;  %v453_v63 = vrot.slane %v274_v43, 7  ;;  %v454_v0 = vrot.slane %v276_v46, 7  ;;  %v581_v1 = vrot.slane %v1468_v12, 3  ;;  %v582_v2 = vrot.slane %v1472_v14, 3 }
  0xf1   : > { %338 = vrot.lane.b32.xlu0 %v334_v19, %s1328_s3  ;;  %v592_v3 = vrot.slane %v1468_v12, 4  ;;  %v593_v4 = vrot.slane %v1472_v14, 4  ;;  %v603_v5 = vrot.slane %v1468_v12, 5  ;;  %v604_v6 = vrot.slane %v1472_v14, 5 }
  0xf2   : > { %v295_v22 = vpop.f32.mrf.mxu1  ;;  %v614_v9 = vrot.slane %v1468_v12, 6  ;;  %v307_v10 = vlaneseq  ;;  %v615_v13 = vrot.slane %v1472_v14, 6  ;;  %v625_v19 = vrot.slane %v1468_v12, 7 }
  0xf3   : > { %318 = vrot.lane.b32.xlu1 %v313_v21, %s1324_s26  ;;  %s1339_s26 = smov 64   ;;  %v626_v22 = vrot.slane %v1472_v14, 7 }
  0xf4   : > { %v1527_v20 = vand.u32 127, %v307_v10 }
  0xf5   : > { %349 = vrot.lane.b32.xlu0 %v345_v23, %s1329_s4 }
  0xf6   : > { %vm468_vm2 = vcmp.lt.s32.totalorder %v1527_v20, 92  ;;  %vm320_vm3 = vcmp.lt.s32.totalorder %v1527_v20, 126  ;;  %vm331_vm4 = vcmp.lt.s32.totalorder %v1527_v20, 125  ;;  %vm342_vm5 = vcmp.lt.s32.totalorder %v1527_v20, 124 }
  0xf7   : > { %329 = vrot.lane.b32.xlu1 %v324_v24, %s1327_s30  ;;  %s1341_s30 = smov 108   ;;  %vm353_vm6 = vcmp.lt.s32.totalorder %v1527_v20, 123  ;;  %vm364_vm7 = vcmp.lt.s32.totalorder %v1527_v20, 112  ;;  %vm375_vm8 = vcmp.lt.s32.totalorder %v1527_v20, 111  ;;  %vm492_vm9 = vcmp.lt.s32.totalorder %v1527_v20, 80 }
  0xf8   : > { %vm503_vm10 = vcmp.lt.s32.totalorder %v1527_v20, 79  ;;  %vm514_vm11 = vcmp.lt.s32.totalorder %v1527_v20, 78  ;;  %vm525_vm12 = vcmp.lt.s32.totalorder %v1527_v20, 77  ;;  %vm309_vm13 = vcmp.lt.s32.totalorder %v1527_v20, 127 }
  0xf9   : > { %360 = vrot.lane.b32.xlu0 %v356_v25, %s1330_s5 }
  0xfb   : > { %340 = vrot.lane.b32.xlu1 %v335_v26, %s1328_s3  ;;  %s1342_s3 = smov 107  }
  0xfd   : > { %371 = vrot.lane.b32.xlu0 %v367_v27, %s1331_s6  ;;  %v645_v27 = vrot.slane %v1476_v16, 1 }
  0xff   : > { %351 = vrot.lane.b32.xlu1 %v346_v28, %s1329_s4  ;;  %s1344_s4 = smov 95   ;;  %v646_v28 = vrot.slane %v1480_v18, 1 }
 0x101   : > { %488 = vrot.lane.b32.xlu0 %v484_v29, %s1332_s7 }
 0x103   : > { %362 = vrot.lane.b32.xlu1 %v357_v30, %s1330_s5  ;;  %s1345_s5 = smov 63  }
 0x105   : > { %499 = vrot.lane.b32.xlu0 %v495_v31, %s1333_s8 }
 0x107   : > { %373 = vrot.lane.b32.xlu1 %v368_v32, %s1331_s6  ;;  %s1346_s6 = smov 94   ;;  %v656_v32 = vrot.slane %v1476_v16, 2 }
 0x109   : > { %510 = vrot.lane.b32.xlu0 %v506_v33, %s1334_s17 }
 0x10b   : > { %490 = vrot.lane.b32.xlu1 %v485_v34, %s1332_s7  ;;  %s1347_s7 = smov 62   ;;  %v657_v34 = vrot.slane %v1480_v18, 2 }
 0x10d   : > { %521 = vrot.lane.b32.xlu0 %v517_v35, %s1335_s18 }
 0x10f   : > { %501 = vrot.lane.b32.xlu1 %v496_v36, %s1333_s8  ;;  %s1348_s8 = smov 93  }
 0x111   : > { %532 = vrot.lane.b32.xlu0 %v528_v37, %s1336_s21 }
 0x113   : > { %512 = vrot.lane.b32.xlu1 %v507_v38, %s1334_s17  ;;  %s1349_s17 = smov 61   ;;  %v667_v38 = vrot.slane %v1476_v16, 3 }
 0x115   : > { %543 = vrot.lane.b32.xlu0 %v539_v39, %s1337_s24 }
 0x117   : > { %523 = vrot.lane.b32.xlu1 %v518_v40, %s1335_s18  ;;  %s1350_s18 = smov 60   ;;  %v668_v40 = vrot.slane %v1480_v18, 3 }
 0x119   : > { %305 = vrot.lane.b32.xlu0 %v300_v41, %s1325_s28  ;;  %s1340_s28 = smov 109  }
 0x11b   : > { %534 = vrot.lane.b32.xlu1 %v529_v42, %s1336_s21  ;;  %s1351_s21 = smov 59  }
 0x11d   : > { %378 = vrot.lane.b32.xlu0 %v274_v43, %s1338_s25 }
 0x11f   : > { %545 = vrot.lane.b32.xlu1 %v540_v44, %s1337_s24  ;;  %s1352_s24 = smov 48  }
 0x121   : > { %479 = vrot.lane.b32.xlu0 %v474_v45, %s1326_s29  ;;  %s1343_s29 = smov 96  }
 0x123   : > { %380 = vrot.lane.b32.xlu1 %v276_v46, %s1338_s25  ;;  %s1353_s25 = smov 47  }
 0x125   : > { %550 = vrot.lane.b32.xlu0 %v1468_v12, %s1339_s26 }
 0x127   : > { %552 = vrot.lane.b32.xlu1 %v1472_v14, %s1339_s26  ;;  %s1354_s26 = smov 46  }
 0x129   : > { %391 = vrot.lane.b32.xlu0 %v387_v47, %s1340_s28 }
 0x12b   : > { %393 = vrot.lane.b32.xlu1 %v388_v48, %s1340_s28  ;;  %s1355_s28 = smov 45  }
 0x12d   : > { %402 = vrot.lane.b32.xlu0 %v398_v49, %s1341_s30 }
 0x12f   : > { %404 = vrot.lane.b32.xlu1 %v399_v50, %s1341_s30  ;;  %s1356_s30 = smov 44  }
 0x131   : > { %413 = vrot.lane.b32.xlu0 %v409_v51, %s1342_s3 }
 0x133   : > { %415 = vrot.lane.b32.xlu1 %v410_v52, %s1342_s3  ;;  %s1357_s3 = smov 43  }
 0x135   : > { %424 = vrot.lane.b32.xlu0 %v420_v53, %s1343_s29 }
 0x137   : > { %426 = vrot.lane.b32.xlu1 %v421_v54, %s1343_s29  ;;  %s173_s29 = sand.u32 1, %s1296_s10  }
 0x139   : > { %435 = vrot.lane.b32.xlu0 %v431_v55, %s1344_s4 }
 0x13b   : > { %437 = vrot.lane.b32.xlu1 %v432_v56, %s1344_s4  ;;  %s1095_s4 = sshll.u32 %s173_s29, 1 }
 0x13d   : > { %563 = vrot.lane.b32.xlu0 %v559_v57, %s1345_s5 }
 0x13f   : > { %565 = vrot.lane.b32.xlu1 %v560_v58, %s1345_s5  ;;  %s1109_s5 = sshll.u32 %s1304_s12, 1 }
 0x141   : > { %446 = vrot.lane.b32.xlu0 %v442_v59, %s1346_s6 }
 0x143   : > { %448 = vrot.lane.b32.xlu1 %v443_v60, %s1346_s6  ;;  %s1110_s6 = sshll.u32 %s1308_s13, 2  ;;  %s980_s13 = scalar_lea.sflag [#allocation3], %s173_s29 }
 0x145   : > { %574 = vrot.lane.b32.xlu0 %v570_v61, %s1347_s7 }
 0x147   : > { %576 = vrot.lane.b32.xlu1 %v571_v62, %s1347_s7  ;;  %s992_s7 = sadd.s32 %s1110_s6, %s1109_s5 }
 0x149   : > { %457 = vrot.lane.b32.xlu0 %v453_v63, %s1348_s8 }
 0x14b   : > { %459 = vrot.lane.b32.xlu1 %v454_v0, %s1348_s8  ;;  %s1111_s8 = sshll.u32 %s992_s7, 4 }
 0x14c   : > { %s994_s12 = scalar_lea.hbm %s1835_s2, %s1111_s8 }
 0x14d   : > { %585 = vrot.lane.b32.xlu0 %v581_v1, %s1349_s17 }
 0x14f   : > { %587 = vrot.lane.b32.xlu1 %v582_v2, %s1349_s17  ;;  %s175_s17 = scalar_lea.vmem [#allocation2], %s1095_s4 }
 0x151   : > { %596 = vrot.lane.b32.xlu0 %v592_v3, %s1350_s18 }
 0x153   : > { %598 = vrot.lane.b32.xlu1 %v593_v4, %s1350_s18  ;;  %s996_s18 = sshll.u32 %s175_s17, 4  ;;  %s997_s18 = int_to_ptr.vmem [resolvable:$true] %s996_s18 }
 0x155   : > { %607 = vrot.lane.b32.xlu0 %v603_v5, %s1351_s21 }
 0x157   : > { %v465_v8 = vpop.permute.xlu0 %464  ;;  %609 = vrot.lane.b32.xlu1 %v604_v6, %s1351_s21 }
 0x159   : > { %v317_v11 = vpop.permute.xlu1 %316  ;;  %618 = vrot.lane.b32.xlu0 %v614_v9, %s1352_s24 }
 0x15b   : > { %v1523_v15 = vpop.permute.xlu0 %303  ;;  %620 = vrot.lane.b32.xlu1 %v615_v13, %s1352_s24 }
 0x15d   : > { %v1529_v21 = vpop.permute.xlu1 %477  ;;  %629 = vrot.lane.b32.xlu0 %v625_v19, %s1353_s25 }
 0x15f   : > { %v328_v23 = vpop.permute.xlu0 %327  ;;  %631 = vrot.lane.b32.xlu1 %v626_v22, %s1353_s25  ;;  %s1228_s25 = scalar_lea.vmem %s997_s18, 32 }
 0x160   : > { %p1229_p0 = scmp.ne.s32.totalorder %s997_s18, %s1228_s25 }
 0x161   : > { %v467_v24 = vpop.permute.xlu1 %466  ;;  %636 = vrot.lane.b32.xlu0 %v1476_v16, %s1354_s26 }
 0x162   : > { %v1534_v25 = vsel %vm468_vm2, %v465_v8, %v467_v24  ;;  %v1536_v12 = vsel %vm468_vm2, %v467_v24, %v465_v8  ;;  %vm536_vm2 = vcmp.lt.s32.totalorder %v1527_v20, 76  ;;  %p1230_p1 = pnand %p1229_p0, %p1426_p3 }
 0x163   : > { %v339_v26 = vpop.permute.xlu0 %338  ;;  %638 = vrot.lane.b32.xlu1 %v1480_v18, %s1354_s26  ;;  %s1359_s26 = smov [#allocation2]  }
 0x164   : > { %p1231_p2 = pneg %p1230_p1 }
 0x165   : > { %v319_v14 = vpop.permute.xlu1 %318  ;;  %649 = vrot.lane.b32.xlu0 %v645_v27, %s1355_s28 }
 0x166   : > { %v1542_v29 = vsel %vm320_vm3, %v317_v11, %v319_v14  ;;  %v1544_v30 = vsel %vm320_vm3, %v319_v14, %v317_v11  ;;  %vm547_vm3 = vcmp.lt.s32.totalorder %v1527_v20, 75 }
 0x167   : > { %v350_v31 = vpop.permute.xlu0 %349  ;;  %651 = vrot.lane.b32.xlu1 %v646_v28, %s1355_s28  ;;  %v686_v6 = vrot.slane %v1542_v29, 6  ;;  %v687_v8 = vrot.slane %v1544_v30, 6  ;;  %s1232_s28 = sshll.u32 %s1359_s26, 4  ;;  %s1233_s28 = int_to_ptr.vmem [resolvable:$false] %s1232_s28 }
 0x168   : > { %p1235_p4 = scmp.lt.s32.totalorder %s997_s18, %s1233_s28 }
 0x169   : > { %v330_v33 = vpop.permute.xlu1 %329  ;;  %660 = vrot.lane.b32.xlu0 %v656_v32, %s1356_s30 }
 0x16a   : > { %v1549_v35 = vsel %vm331_vm4, %v328_v23, %v330_v33  ;;  %v1551_v36 = vsel %vm331_vm4, %v330_v33, %v328_v23  ;;  %vm481_vm4 = vcmp.lt.s32.totalorder %v1527_v20, 91 }
 0x16b   : > { %v361_v37 = vpop.permute.xlu0 %360  ;;  %662 = vrot.lane.b32.xlu1 %v657_v34, %s1356_s30  ;;  %v692_v13 = vrot.slane %v1549_v35, 5  ;;  %v693_v19 = vrot.slane %v1551_v36, 5  ;;  %s1234_s30 = scalar_lea.vmem %s1233_s28, 64 }
 0x16c   : > { %p1236_p5 = scmp.lt.s32.totalorder %s1234_s30, %s1228_s25 }
 0x16d   : > { %v341_v39 = vpop.permute.xlu1 %340  ;;  %671 = vrot.lane.b32.xlu0 %v667_v38, %s1357_s3 }
 0x16e   : > { %v1556_v41 = vsel %vm342_vm5, %v339_v26, %v341_v39  ;;  %v1558_v42 = vsel %vm342_vm5, %v341_v39, %v339_v26  ;;  %vm382_vm5 = vcmp.lt.s32.totalorder %v1527_v20, 110  ;;  %p1237_p6 = por %p1236_p5, %p1235_p4 }
 0x16f   : > { %v372_v43 = vpop.permute.xlu0 %371  ;;  %673 = vrot.lane.b32.xlu1 %v668_v40, %s1357_s3  ;;  %v698_v26 = vrot.slane %v1556_v41, 4  ;;  %v699_v27 = vrot.slane %v1558_v42, 4 }
 0x170   : > { %p1238_p7 = pnand %p1237_p6, %p1231_p2 }
 0x171   : > { %v352_v44 = vpop.permute.xlu1 %351 }
 0x172   : > { %v1561_v45 = vsel %vm353_vm6, %v350_v31, %v352_v44  ;;  %v1563_v46 = vsel %vm353_vm6, %v352_v44, %v350_v31  ;;  %vm773_vm6 = vcmask 1044480  }
 0x173   : > { %v489_v47 = vpop.permute.xlu0 %488  ;;  %v705_v29 = vrot.slane %v1563_v46, 3 }
 0x175   : > { %v363_v16 = vpop.permute.xlu1 %362 }
 0x176   : > { %v1566_v48 = vsel %vm364_vm7, %v361_v37, %v363_v16  ;;  %v1568_v18 = vsel %vm364_vm7, %v363_v16, %v361_v37  ;;  %vm776_vm7 = vcmask 1045504  }
 0x177   : > { %v500_v49 = vpop.permute.xlu0 %499  ;;  %v710_v33 = vrot.slane %v1566_v48, 2  ;;  %v711_v34 = vrot.slane %v1568_v18, 2 }
 0x179   : > { %v374_v50 = vpop.permute.xlu1 %373 }
 0x17a   : > { %v1571_v51 = vsel %vm375_vm8, %v372_v43, %v374_v50  ;;  %v1573_v52 = vsel %vm375_vm8, %v374_v50, %v372_v43  ;;  %vm779_vm8 = vcmask 1046528  }
 0x17b   : > { %v511_v53 = vpop.permute.xlu0 %510  ;;  %v716_v37 = vrot.slane %v1571_v51, 1  ;;  %v717_v38 = vrot.slane %v1573_v52, 1 }
 0x17d   : > { %v491_v54 = vpop.permute.xlu1 %490 }
 0x17e   : > { %v1576_v55 = vsel %vm492_vm9, %v489_v47, %v491_v54  ;;  %v1578_v56 = vsel %vm492_vm9, %v491_v54, %v489_v47  ;;  %vm554_vm9 = vcmp.lt.s32.totalorder %v1527_v20, 64 }
 0x17f   : > { %v522_v57 = vpop.permute.xlu0 %521  ;;  %v804_v44 = vrot.slane %v1576_v55, 6 }
 0x181   : > { %v502_v58 = vpop.permute.xlu1 %501 }
 0x182   : > { %v1581_v59 = vsel %vm503_vm10, %v500_v49, %v502_v58  ;;  %v1583_v60 = vsel %vm503_vm10, %v502_v58, %v500_v49  ;;  %vm395_vm10 = vcmp.lt.s32.totalorder %v1527_v20, 109 }
 0x183   : > { %v533_v61 = vpop.permute.xlu0 %532 }
 0x185   : > { %v513_v62 = vpop.permute.xlu1 %512 }
 0x186   : > { %v1586_v63 = vsel %vm514_vm11, %v511_v53, %v513_v62  ;;  %v1588_v0 = vsel %vm514_vm11, %v513_v62, %v511_v53  ;;  %vm406_vm11 = vcmp.lt.s32.totalorder %v1527_v20, 108 }
 0x187   : > { %v544_v1 = vpop.permute.xlu0 %543  ;;  %v817_v62 = vrot.slane %v1588_v0, 4 }
 0x189   : > { %v524_v2 = vpop.permute.xlu1 %523 }
 0x18a   : > { %v1593_v3 = vsel %vm525_vm12, %v522_v57, %v524_v2  ;;  %v1595_v4 = vsel %vm525_vm12, %v524_v2, %v522_v57  ;;  %v811_v57 = vrot.slane %v1583_v60, 5  ;;  %vm417_vm12 = vcmp.lt.s32.totalorder %v1527_v20, 107 }
 0x18b   : > { %v306_v5 = vpop.permute.xlu0 %305  ;;  %v822_v60 = vrot.slane %v1593_v3, 3 }
 0x18c   : > { %v310_v9 = vsel %vm309_vm13, %v1523_v15, %v306_v5  ;;  %v311_v11 = vsel %vm309_vm13, %v306_v5, %v1523_v15  ;;  %v704_v15 = vrot.slane %v1561_v45, 3  ;;  %v805_v45 = vrot.slane %v1578_v56, 6 }
 0x18d   : > { %v680_v22 = vrot.slane %v310_v9, 7  ;;  %v681_v23 = vrot.slane %v311_v11, 7  ;;  %v535_v24 = vpop.permute.xlu1 %534  ;;  %v810_v56 = vrot.slane %v1581_v59, 5  ;;  %v823_v5 = vrot.slane %v1595_v4, 3 }
 0x18e   : > { %v1614_v14 = vsel %vm536_vm2, %v533_v61, %v535_v24  ;;  %v1618_v28 = vsel %vm536_vm2, %v535_v24, %v533_v61  ;;  %v816_v61 = vrot.slane %v1586_v63, 4  ;;  %vm428_vm13 = vcmp.lt.s32.totalorder %v1527_v20, 96 }
 0x18f   : > { %v763_v30 = vsel %vm762_vm14, %v1459_v7, %v680_v22  ;;  %v764_v31 = vsel %vm762_vm14, %v1478_v17, %v681_v23  ;;  %v379_v32 = vpop.permute.xlu0 %378  ;;  %v828_v9 = vrot.slane %v1614_v14, 2  ;;  %v829_v63 = vrot.slane %v1618_v28, 2 }
 0x190   : > { %v765_v35 = vsel %vm229_vm0, %v763_v30, %v686_v6  ;;  %v766_v36 = vsel %vm229_vm0, %v764_v31, %v687_v8  ;;  %vm439_vm2 = vcmp.lt.s32.totalorder %v1527_v20, 95 }
 0x191   : > { %v768_v7 = vsel %vm767_vm15, %v765_v35, %v692_v13  ;;  %v769_v39 = vsel %vm767_vm15, %v766_v36, %v693_v19  ;;  %v546_v17 = vpop.permute.xlu1 %545 }
 0x192   : > { %v771_v40 = vsel %vm770_vm1, %v768_v7, %v698_v26  ;;  %v772_v41 = vsel %vm770_vm1, %v769_v39, %v699_v27  ;;  %v548_v42 = vsel %vm547_vm3, %v544_v1, %v546_v17  ;;  %v549_v43 = vsel %vm547_vm3, %v546_v17, %v544_v1 }
 0x193   : > { %v480_v46 = vpop.permute.xlu0 %479  ;;  %v774_v47 = vsel %vm773_vm6, %v771_v40, %v704_v15  ;;  %v775_v16 = vsel %vm773_vm6, %v772_v41, %v705_v29  ;;  %v834_v19 = vrot.slane %v548_v42, 1  ;;  %v835_v22 = vrot.slane %v549_v43, 1 }
 0x194   : > { %v482_v48 = vsel %vm481_vm4, %v1529_v21, %v480_v46  ;;  %v483_v18 = vsel %vm481_vm4, %v480_v46, %v1529_v21  ;;  %v777_v49 = vsel %vm776_vm7, %v774_v47, %v710_v33  ;;  %v778_v50 = vsel %vm776_vm7, %v775_v16, %v711_v34 }
 0x195   : > { %v798_v51 = vrot.slane %v482_v48, 7  ;;  %v799_v52 = vrot.slane %v483_v18, 7  ;;  %v381_v53 = vpop.permute.xlu1 %380  ;;  %v1654_v54 = vsel %vm779_vm8, %v777_v49, %v716_v37  ;;  %v1657_v55 = vsel %vm779_vm8, %v778_v50, %v717_v38 }
 0x196   : > { %v1663_v21 = vsel %vm382_vm5, %v379_v32, %v381_v53  ;;  %v1667_v58 = vsel %vm382_vm5, %v381_v53, %v379_v32  ;;  %vm450_vm3 = vcmp.lt.s32.totalorder %v1527_v20, 94  ;;  %vm461_vm4 = vcmp.lt.s32.totalorder %v1527_v20, 93 }
 0x197   : > { %v880_v1 = vsel %vm762_vm14, %v1534_v25, %v798_v51  ;;  %v881_v59 = vsel %vm762_vm14, %v1536_v12, %v799_v52  ;;  %v551_v2 = vpop.permute.xlu0 %550  ;;  %vm567_vm5 = vcmp.lt.s32.totalorder %v1527_v20, 63 }
 0x198   : > { %v882_v6 = vsel %vm229_vm0, %v880_v1, %v804_v44  ;;  %v883_v8 = vsel %vm229_vm0, %v881_v59, %v805_v45 }
 0x199   : > { %v884_v0 = vsel %vm767_vm15, %v882_v6, %v810_v56  ;;  %v885_v25 = vsel %vm767_vm15, %v883_v8, %v811_v57  ;;  %v553_v11 = vpop.permute.xlu1 %552 }
 0x19a   : > { %v886_v12 = vsel %vm770_vm1, %v884_v0, %v816_v61  ;;  %v887_v13 = vsel %vm770_vm1, %v885_v25, %v817_v62  ;;  %v1687_v3 = vsel %vm554_vm9, %v551_v2, %v553_v11  ;;  %v1691_v4 = vsel %vm554_vm9, %v553_v11, %v551_v2 }
 0x19b   : > { %v392_v23 = vpop.permute.xlu0 %391  ;;  %v888_v24 = vsel %vm773_vm6, %v886_v12, %v822_v60  ;;  %v889_v26 = vsel %vm773_vm6, %v887_v13, %v823_v5  ;;  %vm578_vm9 = vcmp.lt.s32.totalorder %v1527_v20, 62 }
 0x19c   : > { %v890_v27 = vsel %vm776_vm7, %v888_v24, %v828_v9  ;;  %v891_v14 = vsel %vm776_vm7, %v889_v26, %v829_v63 }
 0x19d   : > { %v394_v28 = vpop.permute.xlu1 %393  ;;  %v1698_v15 = vsel %vm779_vm8, %v890_v27, %v834_v19  ;;  %v1701_v29 = vsel %vm779_vm8, %v891_v14, %v835_v22 }
 0x19e   : > { %v396_v17 = vsel %vm395_vm10, %v392_v23, %v394_v28  ;;  %v397_v40 = vsel %vm395_vm10, %v394_v28, %v392_v23  ;;  %vm589_vm10 = vcmp.lt.s32.totalorder %v1527_v20, 61 }
 0x19f   : > { %v403_v30 = vpop.permute.xlu0 %402  ;;  %v722_v46 = vrot.slane %v396_v17, 7  ;;  %v723_v47 = vrot.slane %v397_v40, 7 }
 0x1a1   : > { %v405_v31 = vpop.permute.xlu1 %404  ;;  %v782_v2 = vsel %vm762_vm14, %v1663_v21, %v722_v46  ;;  %v783_v60 = vsel %vm762_vm14, %v1667_v58, %v723_v47 }
 0x1a2   : > { %v407_v41 = vsel %vm406_vm11, %v403_v30, %v405_v31  ;;  %v408_v42 = vsel %vm406_vm11, %v405_v31, %v403_v30  ;;  %vm600_vm11 = vcmp.lt.s32.totalorder %v1527_v20, 60 }
 0x1a3   : > { %v414_v32 = vpop.permute.xlu0 %413  ;;  %v728_v49 = vrot.slane %v407_v41, 6  ;;  %v729_v50 = vrot.slane %v408_v42, 6 }
 0x1a5   : > { %v416_v33 = vpop.permute.xlu1 %415  ;;  %v784_v9 = vsel %vm229_vm0, %v782_v2, %v728_v49  ;;  %v785_v63 = vsel %vm229_vm0, %v783_v60, %v729_v50 }
 0x1a6   : > { %v418_v44 = vsel %vm417_vm12, %v414_v32, %v416_v33  ;;  %v419_v45 = vsel %vm417_vm12, %v416_v33, %v414_v32  ;;  %vm611_vm12 = vcmp.lt.s32.totalorder %v1527_v20, 59 }
 0x1a7   : > { %v425_v34 = vpop.permute.xlu0 %424  ;;  %v734_v53 = vrot.slane %v418_v44, 5  ;;  %v735_v56 = vrot.slane %v419_v45, 5 }
 0x1a9   : > { %v427_v35 = vpop.permute.xlu1 %426  ;;  %v786_v11 = vsel %vm767_vm15, %v784_v9, %v734_v53  ;;  %v787_v12 = vsel %vm767_vm15, %v785_v63, %v735_v56 }
 0x1aa   : > { %v429_v16 = vsel %vm428_vm13, %v425_v34, %v427_v35  ;;  %v430_v48 = vsel %vm428_vm13, %v427_v35, %v425_v34  ;;  %vm622_vm13 = vcmp.lt.s32.totalorder %v1527_v20, 48 }
 0x1ab   : > { %v436_v36 = vpop.permute.xlu0 %435  ;;  %v740_v1 = vrot.slane %v429_v16, 4  ;;  %v741_v59 = vrot.slane %v430_v48, 4 }
 0x1ad   : > { %v438_v37 = vpop.permute.xlu1 %437  ;;  %v788_v19 = vsel %vm770_vm1, %v786_v11, %v740_v1  ;;  %v789_v21 = vsel %vm770_vm1, %v787_v12, %v741_v59 }
 0x1ae   : > { %v440_v51 = vsel %vm439_vm2, %v436_v36, %v438_v37  ;;  %v441_v52 = vsel %vm439_vm2, %v438_v37, %v436_v36  ;;  %vm633_vm2 = vcmp.lt.s32.totalorder %v1527_v20, 47 }
 0x1af   : > { %v1703_v38 = vpop.permute.xlu0 %563  ;;  %v746_v5 = vrot.slane %v440_v51, 3  ;;  %v747_v6 = vrot.slane %v441_v52, 3 }
 0x1b1   : > { %v1706_v7 = vpop.permute.xlu1 %565  ;;  %v790_v23 = vsel %vm773_vm6, %v788_v19, %v746_v5  ;;  %v791_v24 = vsel %vm773_vm6, %v789_v21, %v747_v6 }
 0x1b2   : > { %v568_v41 = vsel %vm567_vm5, %v1703_v38, %v1706_v7 }
 0x1b3   : > { %v447_v39 = vpop.permute.xlu0 %446  ;;  %v840_v44 = vrot.slane %v568_v41, 7 }
 0x1b5   : > { %v449_v43 = vpop.permute.xlu1 %448 }
 0x1b6   : > { %v451_v57 = vsel %vm450_vm3, %v447_v39, %v449_v43  ;;  %v452_v61 = vsel %vm450_vm3, %v449_v43, %v447_v39  ;;  %vm653_vm3 = vcmp.lt.s32.totalorder %v1527_v20, 45 }
 0x1b7   : > { %v575_v18 = vpop.permute.xlu0 %574  ;;  %v752_v0 = vrot.slane %v451_v57, 2  ;;  %v753_v25 = vrot.slane %v452_v61, 2  ;;  %v894_v61 = vsel %vm762_vm14, %v1687_v3, %v840_v44 }
 0x1b9   : > { %v577_v62 = vpop.permute.xlu1 %576  ;;  %v792_v28 = vsel %vm776_vm7, %v790_v23, %v752_v0  ;;  %v793_v30 = vsel %vm776_vm7, %v791_v24, %v753_v25 }
 0x1bb   : > { %v458_v8 = vpop.permute.xlu0 %457 }
 0x1bd   : > { %v460_v13 = vpop.permute.xlu1 %459 }
 0x1be   : > { %v462_v58 = vsel %vm461_vm4, %v458_v8, %v460_v13  ;;  %v463_v22 = vsel %vm461_vm4, %v460_v13, %v458_v8 }
 0x1bf   : > { %v758_v26 = vrot.slane %v462_v58, 1  ;;  %v759_v27 = vrot.slane %v463_v22, 1  ;;  %v586_v14 = vpop.permute.xlu0 %585 }
 0x1c1   : > { %v794_v31 = vsel %vm779_vm8, %v792_v28, %v758_v26  ;;  %v795_v32 = vsel %vm779_vm8, %v793_v30, %v759_v27  ;;  %v588_v33 = vpop.permute.xlu1 %587 }
 0x1c2   : > { %v932_v34 = vadd.f32 %v794_v31, %v1654_v54  ;;  %v943_v35 = vadd.f32 %v795_v32, %v1657_v55  ;;  %v569_v54 = vsel %vm567_vm5, %v1706_v7, %v1703_v38  ;;  %v579_v55 = vsel %vm578_vm9, %v575_v18, %v577_v62 }
 0x1c3   : > { %v597_v36 = vpop.permute.xlu0 %596  ;;  %v590_v42 = vsel %vm589_vm10, %v586_v14, %v588_v33  ;;  %v591_v43 = vsel %vm589_vm10, %v588_v33, %v586_v14  ;;  %v841_v45 = vrot.slane %v569_v54, 7  ;;  %v846_v48 = vrot.slane %v579_v55, 6 }
 0x1c4   : > { %v933_v37 = vadd.f32 %v932_v34, %v1698_v15  ;;  %v944_v39 = vadd.f32 %v943_v35, %v1701_v29  ;;  %v580_v15 = vsel %vm578_vm9, %v577_v62, %v575_v18  ;;  %v852_v7 = vrot.slane %v590_v42, 5 }
 0x1c5   : > { %v599_v17 = vpop.permute.xlu1 %598  ;;  %v847_v49 = vrot.slane %v580_v15, 6  ;;  %v853_v51 = vrot.slane %v591_v43, 5  ;;  %v895_v62 = vsel %vm762_vm14, %v1691_v4, %v841_v45  ;;  %v896_v60 = vsel %vm229_vm0, %v894_v61, %v846_v48 }
 0x1c6   : > { %v601_v46 = vsel %vm600_vm11, %v597_v36, %v599_v17  ;;  %v602_v47 = vsel %vm600_vm11, %v599_v17, %v597_v36  ;;  %v898_v9 = vsel %vm767_vm15, %v896_v60, %v852_v7 }
 0x1c7   : > { %v608_v40 = vpop.permute.xlu0 %607  ;;  %v858_v18 = vrot.slane %v601_v46, 4  ;;  %v859_v53 = vrot.slane %v602_v47, 4  ;;  %v897_v5 = vsel %vm229_vm0, %v895_v62, %v847_v49  ;;  %v1358_v62 = vmov 1966171168  }
 0x1c8   : > { %v899_v63 = vsel %vm767_vm15, %v897_v5, %v853_v51 }
 0x1c9   : > { %v610_v29 = vpop.permute.xlu1 %609  ;;  %v900_v25 = vsel %vm770_vm1, %v898_v9, %v858_v18  ;;  %v901_v3 = vsel %vm770_vm1, %v899_v63, %v859_v53 }
 0x1ca   : > { %v612_v50 = vsel %vm611_vm12, %v608_v40, %v610_v29  ;;  %v613_v38 = vsel %vm611_vm12, %v610_v29, %v608_v40 }
 0x1cb   : > { %v619_v16 = vpop.permute.xlu0 %618  ;;  %v864_v1 = vrot.slane %v612_v50, 3  ;;  %v865_v59 = vrot.slane %v613_v38, 3 }
 0x1cd   : > { %v621_v52 = vpop.permute.xlu1 %620  ;;  %v902_v12 = vsel %vm773_vm6, %v900_v25, %v864_v1  ;;  %v903_v13 = vsel %vm773_vm6, %v901_v3, %v865_v59  ;;  %vm664_vm6 = vcmp.lt.s32.totalorder %v1527_v20, 44  ;;  %v960_v1 = vunpack.c.l.s4 %v1358_v62 }
 0x1ce   : > { %v623_v56 = vsel %vm622_vm13, %v619_v16, %v621_v52  ;;  %v624_v57 = vsel %vm622_vm13, %v621_v52, %v619_v16 }
 0x1cf   : > { %v630_v2 = vpop.permute.xlu0 %629  ;;  %v870_v6 = vrot.slane %v623_v56, 2  ;;  %v871_v8 = vrot.slane %v624_v57, 2 }
 0x1d1   : > { %v632_v0 = vpop.permute.xlu1 %631  ;;  %v904_v22 = vsel %vm776_vm7, %v902_v12, %v870_v6  ;;  %v905_v23 = vsel %vm776_vm7, %v903_v13, %v871_v8  ;;  %vm640_vm7 = vcmp.lt.s32.totalorder %v1527_v20, 46  ;;  %v961_v6 = vunpack.c.0.s8 %v960_v1 }
 0x1d2   : > { %v634_v4 = vsel %vm633_vm2, %v630_v2, %v632_v0  ;;  %v635_v11 = vsel %vm633_vm2, %v632_v0, %v630_v2  ;;  %v963_v8 = vshrl.u32 %v307_v10, 7 }
 0x1d3   : > { %v876_v19 = vrot.slane %v634_v4, 1  ;;  %v877_v21 = vrot.slane %v635_v11, 1  ;;  %v637_v58 = vpop.permute.xlu0 %636 }
 0x1d4   : > { %v964_v3 = vsub.s32 %v961_v6, %v963_v8 }
 0x1d5   : > { %v906_v24 = vsel %vm779_vm8, %v904_v22, %v876_v19  ;;  %v907_v26 = vsel %vm779_vm8, %v905_v23, %v877_v21  ;;  %v639_v27 = vpop.permute.xlu1 %638  ;;  %vm675_vm8 = vcmp.lt.s32.totalorder %v1527_v20, 43 }
 0x1d6   : > { %v934_v14 = vadd.f32 %v933_v37, %v906_v24  ;;  %v945_v28 = vadd.f32 %v944_v39, %v907_v26  ;;  %v641_v15 = vsel %vm640_vm7, %v637_v58, %v639_v27  ;;  %v642_v29 = vsel %vm640_vm7, %v639_v27, %v637_v58 }
 0x1d7   : > { %v650_v30 = vpop.permute.xlu0 %649 }
 0x1d9   : > { %v652_v31 = vpop.permute.xlu1 %651 }
 0x1da   : > { %v654_v33 = vsel %vm653_vm3, %v650_v30, %v652_v31  ;;  %v655_v34 = vsel %vm653_vm3, %v652_v31, %v650_v30 }
 0x1db   : > { %v661_v32 = vpop.permute.xlu0 %660  ;;  %v910_v40 = vrot.slane %v654_v33, 7  ;;  %v911_v41 = vrot.slane %v655_v34, 7 }
 0x1dd   : > { %v663_v35 = vpop.permute.xlu1 %662  ;;  %v926_v44 = vsel %vm762_vm14, %v641_v15, %v910_v40  ;;  %v927_v45 = vsel %vm762_vm14, %v642_v29, %v911_v41 }
 0x1de   : > { %v665_v36 = vsel %vm664_vm6, %v661_v32, %v663_v35  ;;  %v666_v17 = vsel %vm664_vm6, %v663_v35, %v661_v32 }
 0x1df   : > { %v916_v37 = vrot.slane %v665_v36, 6  ;;  %v917_v39 = vrot.slane %v666_v17, 6  ;;  %v672_v54 = vpop.permute.xlu0 %671 }
 0x1e1   : > { %v674_v55 = vpop.permute.xlu1 %673  ;;  %v928_v16 = vsel %vm229_vm0, %v926_v44, %v916_v37  ;;  %v929_v48 = vsel %vm229_vm0, %v927_v45, %v917_v39  ;;  %vm976_vm0 = vcmp.lt.s32.totalorder %v307_v10, 256 }
 0x1e2   : > { %v676_v42 = vsel %vm675_vm8, %v672_v54, %v674_v55  ;;  %v677_v43 = vsel %vm675_vm8, %v674_v55, %v672_v54 }
 0x1e3   : > { %v922_v46 = vrot.slane %v676_v42, 5  ;;  %v923_v47 = vrot.slane %v677_v43, 5 }
 0x1e5   : > { %v930_v20 = vsel %vm767_vm15, %v928_v16, %v922_v46  ;;  %v931_v49 = vsel %vm767_vm15, %v929_v48, %v923_v47 }
 0x1e6   : > { %v935_v50 = vsel %vm770_vm1, %v930_v20, 0.0  ;;  %v946_v38 = vsel %vm770_vm1, %v931_v49, 0.0 }
 0x1e7   : > { %v936_v7 = vadd.f32 %v935_v50, %v934_v14  ;;  %v947_v51 = vadd.f32 %v946_v38, %v945_v28 }
 0x1e9   : > { %v937_v52 = vrot.slane %v936_v7, 4  ;;  %v948_v18 = vrot.slane %v947_v51, 4 }
 0x1eb   : > { %v938_v53 = vadd.f32 %v937_v52, %v936_v7  ;;  %v949_v56 = vadd.f32 %v948_v18, %v947_v51 }
 0x1ed   : > { %v939_v57 = vrot.slane %v938_v53, 2  ;;  %v950_v61 = vrot.slane %v949_v56, 2 }
 0x1ef   : > { %v940_v59 = vadd.f32 %v939_v57, %v938_v53  ;;  %v951_v2 = vadd.f32 %v950_v61, %v949_v56 }
 0x1f1   : > { %v941_v60 = vrot.slane %v940_v59, 1  ;;  %v952_v5 = vrot.slane %v951_v2, 1 }
 0x1f3   : > { %v942_v9 = vadd.f32 %v941_v60, %v940_v59  ;;  %v953_v63 = vadd.f32 %v952_v5, %v951_v2 }
 0x1f5   : > { %v954_v0 = vmul.f32 0.001, %v942_v9  ;;  %v955_v25 = vmul.f32 0.001, %v953_v63 }
 0x1f7   : > { %v958_v4 = vcombine.low %v954_v0, %v955_v25 }
 0x1f9   : > { %v965_v11 = vrot.slane %v958_v4, %v964_v3 }
 0x1fb   : > { %v972_v12 = vrot.slane %v965_v11, %v964_v3 }
 0x1fd   : > { %978 = vst.msk [vmem:[%s175_s17] sm:$0x3] %vm976_vm0, %v972_v12 }
 0x1fe   : > { %1241 = shalt.err (!%p1238_p7)
}
 0x1ff   : > { %s1242_s3 = scalar_lea.hbm %s994_s12, 32  ;;  %s1246_s5 = scalar_lea.hbm %s1835_s2, 128 }
 0x200   : > { %p1243_p9 = scmp.ne.s32.totalorder %s994_s12, %s1242_s3  ;;  %p1247_p12 = scmp.lt.s32.totalorder %s994_s12, %s1835_s2 }
 0x201   : > { %p1248_p13 = scmp.lt.s32.totalorder %s1246_s5, %s1242_s3 }
 0x202   : > { %p1244_p10 = pnand %p1243_p9, %p1426_p3 }
 0x203   : > { %p1249_p0 = por %p1248_p13, %p1247_p12 }
 0x204   : > { %p1245_p11 = pneg %p1244_p10 }
 0x206   : > { %p1250_p1 = pnand %p1249_p0, %p1245_p11 }
 0x208   : > { %1253 = shalt.err (!%p1250_p1)
}
 0x209   : > { %1117 = dma.vmem_to_hbm [thread:$0]  (%p1426_p3), %s997_s18, 32, %s994_s12, %s980_s13  }
 0x20a PF: > { %p1123_p2 = scmp.ge.s32.totalorder %s1320_s16, 2  ;;  %s1008_s8 = sand.u32 1, %s1292_s9  }
 0x20b   : > { %s1009_s17 = scalar_lea.sflag [#allocation3], %s1008_s8 }
 0x20c   : > { %p1120_p4 = pnand %p1123_p2, %p1435_p8 }
 0x20e   : > { %p1121_p5 = pneg %p1120_p4 }
 0x210   : > { %1287 = dma.done.wait (%p1121_p5), %s1009_s17, 32  }
 0x211   : > { %1289 = vsyncadd (%p1121_p5), %s1009_s17, 4294967264  ;;  %s15_s16 = sadd.s32 1, %s1320_s16   ;;  %s1838_s9 = smov %s1296_s10 }
 0x212   : > { %p12_p6 = scmp.ge.s32.totalorder %s15_s16, 6   ;;  %s1839_s10 = smov %s1300_s11 }
 0x213   : > { %s1840_s11 = smov %s1444_s27  ;;  %s1841_s12 = smov %s1312_s14 }
 0x214   : > { %s1842_s13 = smov %s1316_s15  ;;  %s1843_s14 = smov %s1846_s19 }
 0x215   : > { %s1844_s15 = smov %s1850_s20  ;;  %14 = sbr.rel (!%p12_p6) target bundleno = 5 (0x5), region = 66 }
 0x21a   :  { %1014 = vsyncpa [#allocation3], 1 }
 0x21b   :  { %1016 = vsyncpa [#allocation3 + $0x1], 1 }

</bundles_post_ra>
